<compile_context>
chip_gen: v7x
topology: tpu7x:2x2x1
jax: 0.10.0
libtpu: 0.0.40
codegen_flags: <defaults>
</compile_context>

<pallas_src>
import functools

import jax
import jax.numpy as jnp
from jax.experimental import pallas as pl
from jax.experimental.pallas import tpu as pltpu


MATMUL_DTYPE = jnp.bfloat16   # MXU operand dtype (accumulation is always f32)


def _round_up(x, m):
    return (x + m - 1) // m * m


def _taps(kh, kw):
    """Conv2dSame tap offsets (dy, dx) in the same order as the weight layout."""
    pt, pw = (kh - 1) // 2, (kw - 1) // 2
    return [(ky - pt, kx - pw) for ky in range(kh) for kx in range(kw)]


def _pick_nb(n):
    """Images fused per grid step (keep >=2 grid steps when the batch allows)."""
    cap = max(n // 2, 2)
    for nb in (8, 4, 2):
        if nb <= cap and n % nb == 0:
            return nb
    return 1


@functools.lru_cache(maxsize=None)
def _roll_is_jnp_like():
    """Probe pltpu.roll's rotation convention once (tiny one-off kernel)."""
    def k(x_ref, o_ref):
        o_ref[...] = pltpu.roll(x_ref[...], 1, axis=1)
    x = jnp.tile(jnp.arange(128, dtype=jnp.float32)[None, :], (8, 1))
    y = pl.pallas_call(k, out_shape=jax.ShapeDtypeStruct((8, 128), jnp.float32))(x)
    # jnp.roll semantics => y[0,0] == x[0,127] == 127
    return bool(y[0, 0] == 127.0)


# ----------------------------------------------------------------------------
# In-kernel SAME conv: ONE MXU matmul against a tap-stacked bf16 patch matrix.
# Tap views are produced with pltpu.roll + precomputed boundary masks (no
# padded-copy concat).  `parts` lets us realize channel concats (merge9) as
# row offsets in the patch matrix without materializing the concat.
# ----------------------------------------------------------------------------
def _conv_from_parts(parts, c_tot, w_mat, b, taps, w_img, masks, pm_ref, L,
                     roll_jnp_like, relu=True):
    """parts: list of (x value (Ci, L) f32, row_offset).  sum Ci == c_tot.
    w_mat: (Cout, len(taps)*c_tot) bf16.  b: (Cout, 1) f32.
    masks: (9, L) f32, index (dy+1)*3+(dx+1).  pm_ref: bf16 VMEM scratch."""
    for t, (dy, dx) in enumerate(taps):
        off = dy * w_img + dx
        base = t * c_tot
        m = None
        if not (dy == 0 and dx == 0):
            mi = (dy + 1) * 3 + (dx + 1)
            m = masks[mi:mi + 1, :]
        shift = ((-off) if roll_jnp_like else off) % L
        for x, ro in parts:
            v = x if off == 0 else pltpu.roll(x, shift, axis=1)
            if m is not None:
                v = v * m
            pm_ref[base + ro: base + ro + x.shape[0], 0:L] = v.astype(pm_ref.dtype)
    K = len(taps) * c_tot
    y = jnp.dot(w_mat, pm_ref[0:K, 0:L], preferred_element_type=jnp.float32) + b
    return jnp.maximum(y, 0.0) if relu else y


# ----------------------------------------------------------------------------
# Fused forward kernel (one grid step == NB images; all activations in VMEM)
# ----------------------------------------------------------------------------
def _build_kernel(C, H, W, NB, cin1_pad):
    HW = H * W
    L = NB * HW
    Wh = W // 2
    Lh = L // 4
    cin9 = 64 + cin1_pad
    t33 = _taps(3, 3)
    t22 = _taps(2, 2)
    rj = _roll_is_jnp_like()   # concrete host-side bool at trace time

    def kernel(sec_ref, img_ref, mf_ref, mh_ref, ds_ref, us_ref,
               dw_ref, db_ref,
               w1_ref, b1_ref, w2_ref, b2_ref, w3_ref, b3_ref,
               w5_ref, b5_ref, w8_ref, b8_ref, w9_ref, b9_ref,
               wr_ref, br_ref,
               out_ref,
               pm_ref, inp_ref):
        mf = mf_ref[...]                       # (9, L)  full-res tap masks
        mh = mh_ref[...]                       # (9, Lh) half-res tap masks

        # ---- secret dense (+ReLU): one (NB,S)@(S,C*HW) MXU matmul ----------
        sec = (sec_ref[0] - 0.5).astype(MATMUL_DTYPE)                  # (NB, S)
        d = jnp.dot(sec, dw_ref[...],
                    preferred_element_type=jnp.float32) + db_ref[...]  # (NB, C*HW)
        d = jnp.maximum(d, 0.0)

        # ---- inputs = [secret ; image ; zero pad rows] as (cin1_pad, L) ----
        if cin1_pad > 2 * C:  # zero only the pad rows (review item)
            inp_ref[2 * C:cin1_pad, :] = jnp.zeros((cin1_pad - 2 * C, L), jnp.float32)
        inp_ref[C:2 * C, :] = img_ref[0] - 0.5                         # image rows
        for n in range(NB):                                            # secret rows
            for c in range(C):
                inp_ref[c:c + 1, n * HW:(n + 1) * HW] = d[n:n + 1, c * HW:(c + 1) * HW]
        inp = inp_ref[...]

        conv1 = _conv_from_parts([(inp, 0)], cin1_pad, w1_ref[...], b1_ref[...],
                                 t33, W, mf, pm_ref, L, rj)
        c2full = _conv_from_parts([(conv1, 0)], 32, w2_ref[...], b2_ref[...],
                                  t33, W, mf, pm_ref, L, rj)
        conv2 = jnp.dot(c2full.astype(MATMUL_DTYPE), ds_ref[...],
                        preferred_element_type=jnp.float32)            # stride-2
        conv3 = _conv_from_parts([(conv2, 0)], 32, w3_ref[...], b3_ref[...],
                                 t33, Wh, mh, pm_ref, Lh, rj)
        up = jnp.dot(conv3.astype(MATMUL_DTYPE), us_ref[...],
                     preferred_element_type=jnp.float32)               # nearest 2x
        up5 = _conv_from_parts([(up, 0)], 64, w5_ref[...], b5_ref[...],
                               t22, W, mf, pm_ref, L, rj)
        conv8 = _conv_from_parts([(up5, 0)], 64, w8_ref[...], b8_ref[...],
                                 t33, W, mf, pm_ref, L, rj)
        # merge9 = [conv1 ; conv8 ; inputs] realized as row offsets in pm_ref
        conv9 = _conv_from_parts([(conv1, 0), (conv8, 32), (inp, 64)], cin9,
                                 w9_ref[...], b9_ref[...], t33, W, mf, pm_ref, L, rj)
        res = jnp.dot(wr_ref[...], conv9.astype(MATMUL_DTYPE),
                      preferred_element_type=jnp.float32) + br_ref[...]  # 1x1, no ReLU
        out_ref[0] = res

    return kernel


# ----------------------------------------------------------------------------
# Host-side parameter prep: weight layout, bf16 casts, masks, selection mats
# ----------------------------------------------------------------------------
def prepare_params(params, H, W, C, NB):
    assert H % 2 == 0 and W % 2 == 0
    _roll_is_jnp_like()                       # populate probe cache outside jit
    HW = H * W
    L = NB * HW
    Hh, Wh = H // 2, W // 2
    Lh = L // 4
    cin1_pad = max(_round_up(2 * C, 16), 16)  # 16-row alignment for bf16 packing

    def wmat(name, cin_pad):
        w, b = params[name]                   # w: (Cout, Cin, KH, KW) PyTorch layout
        cout, cin, kh, kw = w.shape
        wp = jnp.pad(w, ((0, 0), (0, cin_pad - cin), (0, 0), (0, 0)))
        wm = jnp.transpose(wp, (0, 2, 3, 1)).reshape(cout, kh * kw * cin_pad)
        return wm.astype(MATMUL_DTYPE), b.reshape(cout, 1).astype(jnp.float32)

    w1, b1 = wmat("conv1", cin1_pad)
    w2, b2 = wmat("conv2", 32)
    w3, b3 = wmat("conv3", 32)
    w5, b5 = wmat("up5", 64)
    w8, b8 = wmat("conv8", 64)
    w9, b9 = wmat("conv9", 64 + cin1_pad)
    wr, br = wmat("residual", 32)

    def tap_masks(h, w, l):
        p = jnp.arange(l, dtype=jnp.int32)
        row = (p % (h * w)) // w
        col = p % w
        ms = []
        for dy in (-1, 0, 1):
            for dx in (-1, 0, 1):
                ok = ((row + dy >= 0) & (row + dy < h) &
                      (col + dx >= 0) & (col + dx < w))
                ms.append(ok.astype(jnp.float32))
        return jnp.stack(ms, axis=0)          # (9, l)

    maskf = tap_masks(H, W, L)
    maskh = tap_masks(Hh, Wh, Lh)

    # stride-2 column selection (block-diagonal over NB): conv2 = c2full @ ds
    q = jnp.arange(Lh)
    n = q // (HW // 4)
    qq = q % (HW // 4)
    src_d = n * HW + (qq // Wh) * 2 * W + (qq % Wh) * 2
    ds = jnp.zeros((L, Lh), jnp.float32).at[src_d, q].set(1.0).astype(MATMUL_DTYPE)

    # nearest-neighbour 2x replication (block-diagonal): up = conv3 @ us
    p = jnp.arange(L)
    n2 = p // HW
    pp = p % HW
    src_u = n2 * (HW // 4) + ((pp // W) // 2) * Wh + (pp % W) // 2
    us = jnp.zeros((Lh, L), jnp.float32).at[src_u, p].set(1.0).astype(MATMUL_DTYPE)

    return dict(
        maskf=maskf, maskh=maskh, ds=ds, us=us,
        dense_w=params["dense_w"].astype(MATMUL_DTYPE),
        dense_b=params["dense_b"].reshape(1, -1).astype(jnp.float32),
        w1=w1, b1=b1, w2=w2, b2=b2, w3=w3, b3=b3, w5=w5, b5=b5,
        w8=w8, b8=b8, w9=w9, b9=b9, wr=wr, br=br,
    )


# ----------------------------------------------------------------------------
# Fused forward pass wrapper (layout plumbing only; all compute in the kernel)
# ----------------------------------------------------------------------------
@jax.jit
def stegastamp_encoder_fused(prep, secret, image):
    N, C, H, W = image.shape
    S = secret.shape[-1]
    HW = H * W
    NB = prep["maskf"].shape[1] // HW
    assert N % NB == 0
    G = N // NB
    L = NB * HW
    cin1_pad = prep["w1"].shape[1] // 9

    kernel = _build_kernel(C, H, W, NB, cin1_pad)

    sec_b = secret.reshape(G, NB, S)
    # lane-dense layout (G, C, NB*HW), image index major inside the lane dim
    img_b = image.reshape(G, NB, C, HW).transpose(0, 2, 1, 3).reshape(G, C, L)

    bcast = [prep[k] for k in ("maskf", "maskh", "ds", "us", "dense_w", "dense_b",
                               "w1", "b1", "w2", "b2", "w3", "b3", "w5", "b5",
                               "w8", "b8", "w9", "b9", "wr", "br")]

    in_specs = (
        [pl.BlockSpec((1, NB, S), lambda g: (g, 0, 0)),
         pl.BlockSpec((1, C, L), lambda g: (g, 0, 0))]
        + [pl.BlockSpec(a.shape, lambda g: (0, 0)) for a in bcast]
    )

    k_max = 9 * (64 + cin1_pad)
    out_b = pl.pallas_call(
        kernel,
        out_shape=jax.ShapeDtypeStruct((G, C, L), jnp.float32),
        grid=(G,),
        in_specs=in_specs,
        out_specs=pl.BlockSpec((1, C, L), lambda g: (g, 0, 0)),
        scratch_shapes=[
            pltpu.VMEM((k_max, L), MATMUL_DTYPE),     # tap-stacked patch matrix (bf16)
            pltpu.VMEM((cin1_pad, L), jnp.float32),   # [secret ; image] input slab
        ],
        compiler_params=pltpu.CompilerParams(
            dimension_semantics=("parallel",),
            vmem_limit_bytes=32 * 1024 * 1024,
        ),
    )(sec_b, img_b, *bcast)

    return out_b.reshape(G, C, NB, HW).transpose(0, 2, 1, 3).reshape(N, C, H, W)


# ----------------------------------------------------------------------------
# Deterministic synthetic parameters (PyTorch weight layout: (Cout, Cin, K, K))
# ----------------------------------------------------------------------------
def init_params(key, secret_size, H, W, C):
    ks = jax.random.split(key, 16)

    def conv_p(kw_, kb_, cout, cin, k):
        w = jax.random.normal(kw_, (cout, cin, k, k), jnp.float32) * 0.1
        b = jax.random.normal(kb_, (cout,), jnp.float32) * 0.01
        return w, b

    return {
        "dense_w": jax.random.normal(ks[0], (secret_size, H * W * C), jnp.float32) * 0.1,
        "dense_b": jax.random.normal(ks[1], (H * W * C,), jnp.float32) * 0.01,
        "conv1": conv_p(ks[2], ks[3], 32, 2 * C, 3),
        "conv2": conv_p(ks[4], ks[5], 32, 32, 3),
        "conv3": conv_p(ks[6], ks[7], 64, 32, 3),
        "up5": conv_p(ks[8], ks[9], 64, 64, 2),
        "conv8": conv_p(ks[10], ks[11], 32, 64, 3),
        "conv9": conv_p(ks[12], ks[13], 32, 64 + 2 * C, 3),
        "residual": conv_p(ks[14], ks[15], C, 32, 1),
    }


# ----------------------------------------------------------------------------
# Pure-JAX reference (mirrors the PyTorch module) for a correctness check
# ----------------------------------------------------------------------------
def reference_forward(params, secret, image):
    N, C, H, W = image.shape
    secret = secret - 0.5
    image = image - 0.5
    s = jnp.maximum(jnp.dot(secret, params["dense_w"],
                            precision=jax.lax.Precision.HIGHEST) + params["dense_b"], 0.0)
    s = s.reshape(N, C, H, W)
    inp = jnp.concatenate([s, image], axis=1)

    def conv(x, wb, stride=1, relu=True):
        w, b = wb
        k = w.shape[-1]
        lo = (k - 1) // 2
        hi = (k - 1) - lo
        xp = jnp.pad(x, ((0, 0), (0, 0), (lo, hi), (lo, hi)))
        y = jax.lax.conv_general_dilated(
            xp, w, (stride, stride), "VALID",
            dimension_numbers=("NCHW", "OIHW", "NCHW"),
            precision=jax.lax.Precision.HIGHEST)
        y = y + b.reshape(1, -1, 1, 1)
        return jnp.maximum(y, 0.0) if relu else y

    c1 = conv(inp, params["conv1"])
    c2 = conv(c1, params["conv2"], stride=2)
    c3 = conv(c2, params["conv3"])
    up = jnp.repeat(jnp.repeat(c3, 2, axis=2), 2, axis=3)
    u5 = conv(up, params["up5"])
    c8 = conv(u5, params["conv8"])
    m9 = jnp.concatenate([c1, c8, inp], axis=1)
    c9 = conv(m9, params["conv9"])
    return conv(c9, params["residual"], relu=False)


if __name__ == "__main__":
    B, C, H, W, SECRET = 2, 3, 16, 16, 8

    key = jax.random.PRNGKey(0)
    k_sec, k_img, k_par = jax.random.split(key, 3)
    secret = jax.random.uniform(k_sec, (B, SECRET), jnp.float32)
    image = jax.random.uniform(k_img, (B, C, H, W), jnp.float32)
    params = init_params(k_par, SECRET, H, W, C)

    NB = _pick_nb(B)                              # images fused per grid step
    prep = prepare_params(params, H, W, C, NB)    # host-side layout/bf16 prep, once

    out = stegastamp_encoder_fused(prep, secret, image)
    out = jax.block_until_ready(out)

    assert out.shape == (B, C, H, W), out.shape
    assert bool(jnp.all(jnp.isfinite(out)))

    # bf16 MXU operands / f32 accumulation vs f32-HIGHEST reference.
    ref = reference_forward(params, secret, image)
    rel_err = float(jnp.max(jnp.abs(out - ref)) / (jnp.max(jnp.abs(ref)) + 1e-6))
    assert rel_err < 8e-2, f"mismatch vs reference: rel_err={rel_err}"

    print("KERNEL_OK")
</pallas_src>

<mosaic_0001>
module attributes {stable_mosaic.version = 11 : i64} {
  func.func @k(%arg0: memref<8x128xf32, #tpu.memory_space<vmem>>, %arg1: memref<8x128xf32, #tpu.memory_space<vmem>>) attributes {dimension_semantics = [], scalar_prefetch = 0 : i64, scratch_operands = 0 : i64, tpu.core_type = #tpu.core_type<tc>} {
    %c0 = arith.constant 0 : index
    %c0_0 = arith.constant 0 : index
    %0 = vector.load %arg0[%c0, %c0_0] : memref<8x128xf32, #tpu.memory_space<vmem>>, vector<8x128xf32>
    %c1_i32 = arith.constant 1 : i32
    %1 = tpu.dynamic_rotate %0 by %c1_i32 dim 1 : vector<8x128xf32>, i32 -> vector<8x128xf32>
    %c0_1 = arith.constant 0 : index
    %c0_2 = arith.constant 0 : index
    %2 = vector.load %arg1[%c0_1, %c0_2] : memref<8x128xf32, #tpu.memory_space<vmem>>, vector<8x128xf32>
    tpu.vector_store %arg1[%c0_1, %c0_2], %1 {strides = array<i32>} : memref<8x128xf32, #tpu.memory_space<vmem>>, vector<8x128xf32>,
    return
  }
}

</mosaic_0001>

<bundles_post_ra>
// kernel: tpu_custom_call.1
= control target key start
LH: loop header
LB: loop body
LE: loop exit
PB: predicated region body
PF: predicated region fallthrough
CT: control target
= control target key end

     0   :  { %6 = vsyncpa [#allocation3], 0  ;;  %s128_s0 = inlined_call_operand.hbm [shape: f32[8,128], index: 0, kind: input, shape index: {}]   ;;  %s129_s1 = inlined_call_operand.hbm [shape: f32[8,128], index: 1, kind: output, shape index: {}]  }
   0x1   :  { %7 = vsyncpa [#allocation4], 0  ;;  %s91_s6 = smov [#allocation2]   ;;  %s43_s10 = scalar_lea.hbm %s128_s0, 128 }
   0x2   :  { %s14_s7 = sshll.u32 %s91_s6, 4  ;;  %p44_p0 = scmp.ne.s32.totalorder %s128_s0, %s43_s10  ;;  %s15_s7 = int_to_ptr.vmem [resolvable:$true] %s14_s7 }
   0x3   :  { %p47_p1 = scmp.lt.u32.totalorder %s43_s10, %s128_s0 }
   0x5   :  { %p49_p2 = pnand %p47_p1, %p44_p0 }
   0x7   :  { %52 = shalt.err (!%p49_p2)
}
   0x8   :  { %s53_s15 = scalar_lea.vmem %s15_s7, 128  ;;  %p58_p4 = scmp.lt.s32.totalorder %s15_s7, %s15_s7 }
   0x9   :  { %p54_p3 = scmp.ne.s32.totalorder %s15_s7, %s53_s15  ;;  %p59_p5 = scmp.lt.s32.totalorder %s53_s15, %s53_s15 }
   0xb   :  { %p60_p6 = por %p59_p5, %p58_p4 }
   0xd   :  { %p61_p7 = pnand %p60_p6, %p54_p3 }
   0xf   :  { %64 = shalt.err (!%p61_p7)
}
  0x10   :  { %17 = dma.hbm_to_vmem [thread:$0]  %s128_s0, 128, %s15_s7, [#allocation3]  }
  0x11   :  { %87 = dma.done.wait [#allocation3], 128  }
  0x12   :  { %88 = vsyncadd [#allocation3], 4294967168  ;;  %v21_v0 = vld [vmem:[#allocation2] sm:$0xff]  ;;  %s92_s18 = smov 1   ;;  %s93_s19 = smov [#allocation5]  }
  0x13   :  { %22 = vrot.lane.b32.xlu0 %v21_v0, %s92_s18  ;;  %s31_s20 = sshll.u32 %s93_s19, 4  ;;  %s32_s20 = int_to_ptr.vmem [resolvable:$true] %s31_s20 }
  0x14   :  { %s65_s21 = scalar_lea.vmem %s32_s20, 128  ;;  %p70_p9 = scmp.lt.s32.totalorder %s32_s20, %s32_s20 }
  0x15   :  { %p66_p8 = scmp.ne.s32.totalorder %s32_s20, %s65_s21  ;;  %p71_p10 = scmp.lt.s32.totalorder %s65_s21, %s65_s21 }
  0x17   :  { %p72_p11 = por %p71_p10, %p70_p9 }
  0x19   :  { %p73_p12 = pnand %p72_p11, %p66_p8 }
  0x85   :  { %v23_v1 = vpop.permute.xlu0 %22 }
  0x86   :  { %24 = vst [vmem:[#allocation5] sm:$0xff] %v23_v1 }
  0x87   :  { %76 = shalt.err (!%p73_p12)
}
  0x88   :  { %s77_s0 = scalar_lea.hbm %s129_s1, 128 }
  0x89   :  { %p78_p13 = scmp.ne.s32.totalorder %s129_s1, %s77_s0  ;;  %p81_p0 = scmp.lt.u32.totalorder %s77_s0, %s129_s1 }
  0x8b   :  { %p83_p1 = pnand %p81_p0, %p78_p13 }
  0x8d   :  { %86 = shalt.err (!%p83_p1)
}
  0x8e   :  { %34 = dma.vmem_to_hbm [thread:$0]  %s32_s20, 128, %s129_s1, [#allocation4]  }
  0x8f   :  { %89 = dma.done.wait [#allocation4], 128  }
  0x90   :  { %90 = vsyncadd [#allocation4], 4294967168 }
  0x91   :  { %38 = vsyncpa [#allocation3], 1 }
  0x92   :  { %39 = vsyncpa [#allocation4], 1 }

</bundles_post_ra>
